<compile_context>
chip_gen: v7x
topology: tpu7x:2x2x1
jax: 0.10.0
libtpu: 0.0.40
codegen_flags: <defaults>
</compile_context>

<pallas_src>
import functools

import jax
import jax.numpy as jnp
from jax.experimental import pallas as pl
from jax.experimental.pallas import tpu as pltpu


def _round_up(n: int, m: int) -> int:
    return ((n + m - 1) // m) * m


def _elementwise_dtype():
    """bf16 elementwise on v6e/v7x (bf16 VALU), f32 on v5e and older / unknown."""
    try:
        kind = jax.devices()[0].device_kind.lower()
    except Exception:
        return jnp.float32
    if "v6" in kind or "v7" in kind:
        return jnp.bfloat16
    return jnp.float32


def value_mlp_kernel(xt_ref, w1t_ref, b1t_ref, w2t_ref, b2t_ref, w3t_ref, b3_ref, o_ref,
                     *, compute_dtype):
    """One batch tile, transposed layout: batch on lanes, features on sublanes.

    xt_ref : (S, TILE_B)    input states (f32)
    w1t_ref: (128, S)       layer-1 weight, bf16 (out_features x in_features)
    b1t_ref: (128, 1)       compute_dtype
    w2t_ref: (64, 128)      layer-2 weight, bf16
    b2t_ref: (64, 1)        compute_dtype
    w3t_ref: (64, 1)        compute_dtype
    b3_ref : (1, 1)         f32
    o_ref  : (1, TILE_B)    lane-dense value output row, f32
    """
    # Layer 1: (128, S) @ (S, TILE_B) on the MXU, bf16 operands, f32 accumulation.
    xt = xt_ref[...].astype(jnp.bfloat16)
    h1 = jnp.dot(w1t_ref[...], xt, preferred_element_type=jnp.float32)       # (128, TILE_B) f32
    h1 = jnp.maximum(h1.astype(compute_dtype) + b1t_ref[...], 0)             # bias+ReLU
    h1 = h1.astype(jnp.bfloat16)                                             # no-op when bf16

    # Layer 2: (64, 128) @ (128, TILE_B) on the MXU, f32 accumulation (no padding to 128).
    h2 = jnp.dot(w2t_ref[...], h1, preferred_element_type=jnp.float32)       # (64, TILE_B) f32
    h2 = jnp.maximum(h2.astype(compute_dtype) + b2t_ref[...], 0)             # (64, TILE_B)

    # Layer 3 (Linear(64,1)): VPU multiply + sublane (XLU) reduction; f32 accumulation.
    prod = h2 * w3t_ref[...]                                                 # (64, TILE_B)
    out = jnp.sum(prod, axis=0, keepdims=True, dtype=jnp.float32) + b3_ref[...]
    o_ref[...] = out.astype(o_ref.dtype)                                     # (1, TILE_B)


def value_network_forward(x, params, tile_b: int = 8192):
    """x: (B, state_dim) f32.  params: torch-style Linear params stored as (in, out) / (1, out)."""
    w1, b1, w2, b2, w3, b3 = params
    B, S = x.shape
    H1 = w1.shape[1]          # 128
    H2 = w2.shape[1]          # 64

    compute_dtype = _elementwise_dtype()

    # ---- parameter plumbing (tiny, once per call, outside the kernel) ----
    w1t = jnp.asarray(w1.T, dtype=jnp.bfloat16)                    # (H1, S)
    b1t = jnp.asarray(b1.reshape(H1, 1), dtype=compute_dtype)      # (H1, 1)
    w2t = jnp.asarray(w2.T, dtype=jnp.bfloat16)                    # (H2, H1)
    b2t = jnp.asarray(b2.reshape(H2, 1), dtype=compute_dtype)      # (H2, 1)
    w3t = jnp.asarray(w3, dtype=compute_dtype)                     # (H2, 1)
    b3r = jnp.asarray(b3.reshape(1, 1), dtype=jnp.float32)         # (1, 1)

    # ---- batch tiling: batch on the lane axis; keep >= 2 tiles when possible (megacore) ----
    bp128 = _round_up(max(B, 1), 128)
    tile = min(int(tile_b), bp128)
    if bp128 >= 256:
        tile = min(tile, _round_up(bp128 // 2, 128))
    tile = max(128, _round_up(tile, 128))
    n_tiles = pl.cdiv(bp128, tile)
    Bp = n_tiles * tile

    # Fused pad + transpose: single extra pass over x (read x once, write xt once).
    xt = jnp.zeros((S, Bp), x.dtype).at[:, :B].set(x.T)            # (S, Bp)

    out_row = pl.pallas_call(
        functools.partial(value_mlp_kernel, compute_dtype=compute_dtype),
        out_shape=jax.ShapeDtypeStruct((1, Bp), jnp.float32),
        grid=(n_tiles,),
        in_specs=[
            pl.BlockSpec((S, tile), lambda i: (0, i)),     # x tile: pipelined per grid step
            pl.BlockSpec((H1, S), lambda i: (0, 0)),       # weights/biases: VMEM-resident
            pl.BlockSpec((H1, 1), lambda i: (0, 0)),
            pl.BlockSpec((H2, H1), lambda i: (0, 0)),
            pl.BlockSpec((H2, 1), lambda i: (0, 0)),
            pl.BlockSpec((H2, 1), lambda i: (0, 0)),
            pl.BlockSpec((1, 1), lambda i: (0, 0)),
        ],
        out_specs=pl.BlockSpec((1, tile), lambda i: (0, i)),       # lane-dense output row
        compiler_params=pltpu.CompilerParams(
            dimension_semantics=("parallel",),             # shard batch tiles across TCs
            vmem_limit_bytes=32 * 1024 * 1024,             # explicit, safe on v5e/v6e/v7x
        ),
    )(xt, w1t, b1t, w2t, b2t, w3t, b3r)

    return out_row[0, :B][:, None]                         # back to (B, 1), torch layout


def init_params(key, state_dimension):
    """torch.nn.Linear-style init U(-1/sqrt(fan_in), 1/sqrt(fan_in)); W stored as (in, out)."""
    dims = [(state_dimension, 128), (128, 64), (64, 1)]
    params = []
    for (fan_in, fan_out) in dims:
        key, kw, kb = jax.random.split(key, 3)
        bound = 1.0 / jnp.sqrt(jnp.float32(fan_in))
        w = jax.random.uniform(kw, (fan_in, fan_out), jnp.float32, -bound, bound)
        b = jax.random.uniform(kb, (1, fan_out), jnp.float32, -bound, bound)
        params += [w, b]
    return tuple(params)


def reference_forward(x, params):
    """Pure f32 reference matching the PyTorch module semantics."""
    w1, b1, w2, b2, w3, b3 = params
    h1 = jnp.maximum(x @ w1 + b1, 0.0)
    h2 = jnp.maximum(h1 @ w2 + b2, 0.0)
    return h2 @ w3 + b3


# TODO(synk): optimizer / save_model / load_model from the torch module are training & I/O
# utilities, not part of the forward pass, and are intentionally not translated.


if __name__ == "__main__":
    key = jax.random.PRNGKey(0)
    key, kx1, kx2 = jax.random.split(key, 3)

    batch = 2
    state_dimension = 8  # small synthetic state dim (e.g. CartPole-like)
    params = init_params(key, state_dimension)

    # Small required test (single tile path).
    x_small = jax.random.normal(kx1, (batch, state_dimension), jnp.float32)
    out_small = jax.block_until_ready(value_network_forward(x_small, params))
    ref_small = reference_forward(x_small, params)
    assert out_small.shape == (batch, 1)
    assert jnp.allclose(out_small, ref_small, atol=2e-2, rtol=2e-2), (out_small, ref_small)

    # Larger check exercising multiple grid tiles + batch padding/slicing.
    big_batch = 1500
    x_big = jax.random.normal(kx2, (big_batch, state_dimension), jnp.float32)
    out_big = jax.block_until_ready(value_network_forward(x_big, params))
    ref_big = reference_forward(x_big, params)
    assert out_big.shape == (big_batch, 1)
    assert jnp.allclose(out_big, ref_big, atol=2e-2, rtol=2e-2)

    print("KERNEL_OK")
</pallas_src>

<mosaic_0001>
module attributes {stable_mosaic.version = 11 : i64} {
  func.func @value_mlp_kernel(%arg0: i32, %arg1: memref<8x128xf32, #tpu.memory_space<vmem>>, %arg2: memref<128x8xbf16, #tpu.memory_space<vmem>>, %arg3: memref<128x1xf32, #tpu.memory_space<vmem>>, %arg4: memref<64x128xbf16, #tpu.memory_space<vmem>>, %arg5: memref<64x1xf32, #tpu.memory_space<vmem>>, %arg6: memref<64x1xf32, #tpu.memory_space<vmem>>, %arg7: memref<1x1xf32, #tpu.memory_space<vmem>>, %arg8: memref<1x128xf32, #tpu.memory_space<vmem>>) attributes {dimension_semantics = [#tpu.dimension_semantics<parallel>], iteration_bounds = array<i64: 1>, scalar_prefetch = 0 : i64, scratch_operands = 0 : i64, tpu.core_type = #tpu.core_type<tc>, window_params = [{transform_indices = @transform_0, window_bounds = array<i64: 8, 128>}, {pipeline_mode = #tpu.pipeline_mode<synchronous>, transform_indices = @transform_1, window_bounds = array<i64: 128, 8>}, {pipeline_mode = #tpu.pipeline_mode<synchronous>, transform_indices = @transform_2, window_bounds = array<i64: 128, 1>}, {pipeline_mode = #tpu.pipeline_mode<synchronous>, transform_indices = @transform_3, window_bounds = array<i64: 64, 128>}, {pipeline_mode = #tpu.pipeline_mode<synchronous>, transform_indices = @transform_4, window_bounds = array<i64: 64, 1>}, {pipeline_mode = #tpu.pipeline_mode<synchronous>, transform_indices = @transform_5, window_bounds = array<i64: 64, 1>}, {pipeline_mode = #tpu.pipeline_mode<synchronous>, transform_indices = @transform_6, window_bounds = array<i64: 1, 1>}, {transform_indices = @transform_7, window_bounds = array<i64: 1, 128>}]} {
    %c0 = arith.constant 0 : index
    %c0_0 = arith.constant 0 : index
    %0 = vector.load %arg1[%c0, %c0_0] : memref<8x128xf32, #tpu.memory_space<vmem>>, vector<8x128xf32>
    %1 = arith.truncf %0 : vector<8x128xf32> to vector<8x128xbf16>
    %c0_1 = arith.constant 0 : index
    %c0_2 = arith.constant 0 : index
    %2 = vector.load %arg2[%c0_1, %c0_2] : memref<128x8xbf16, #tpu.memory_space<vmem>>, vector<128x8xbf16>
    %cst = arith.constant dense<0.000000e+00> : vector<128x128xf32>
    %3 = tpu.matmul %2, %1, %cst {dimension_numbers = #tpu.dot_dimension_numbers<[1], [0], [0], [1], [0, 0, 1, 1], [], []>} : vector<128x8xbf16>, vector<8x128xbf16>, vector<128x128xf32> -> vector<128x128xf32>
    %c0_3 = arith.constant 0 : index
    %c0_4 = arith.constant 0 : index
    %4 = vector.load %arg3[%c0_3, %c0_4] : memref<128x1xf32, #tpu.memory_space<vmem>>, vector<128x1xf32>
    %5 = vector.broadcast %4 : vector<128x1xf32> to vector<128x128xf32>
    %6 = arith.addf %3, %5 : vector<128x128xf32>
    %cst_5 = arith.constant 0.000000e+00 : f32
    %7 = vector.broadcast %cst_5 : f32 to vector<128x128xf32>
    %8 = arith.maximumf %6, %7 : vector<128x128xf32>
    %9 = arith.truncf %8 : vector<128x128xf32> to vector<128x128xbf16>
    %c0_6 = arith.constant 0 : index
    %c0_7 = arith.constant 0 : index
    %10 = vector.load %arg4[%c0_6, %c0_7] : memref<64x128xbf16, #tpu.memory_space<vmem>>, vector<64x128xbf16>
    %cst_8 = arith.constant dense<0.000000e+00> : vector<64x128xf32>
    %11 = tpu.matmul %10, %9, %cst_8 {dimension_numbers = #tpu.dot_dimension_numbers<[1], [0], [0], [1], [0, 0, 1, 1], [], []>} : vector<64x128xbf16>, vector<128x128xbf16>, vector<64x128xf32> -> vector<64x128xf32>
    %c0_9 = arith.constant 0 : index
    %c0_10 = arith.constant 0 : index
    %12 = vector.load %arg5[%c0_9, %c0_10] : memref<64x1xf32, #tpu.memory_space<vmem>>, vector<64x1xf32>
    %13 = vector.broadcast %12 : vector<64x1xf32> to vector<64x128xf32>
    %14 = arith.addf %11, %13 : vector<64x128xf32>
    %cst_11 = arith.constant 0.000000e+00 : f32
    %15 = vector.broadcast %cst_11 : f32 to vector<64x128xf32>
    %16 = arith.maximumf %14, %15 : vector<64x128xf32>
    %c0_12 = arith.constant 0 : index
    %c0_13 = arith.constant 0 : index
    %17 = vector.load %arg6[%c0_12, %c0_13] : memref<64x1xf32, #tpu.memory_space<vmem>>, vector<64x1xf32>
    %18 = vector.broadcast %17 : vector<64x1xf32> to vector<64x128xf32>
    %19 = arith.mulf %16, %18 : vector<64x128xf32>
    %cst_14 = arith.constant dense<0.000000e+00> : vector<128xf32>
    %20 = vector.multi_reduction <add>, %19, %cst_14 [0] : vector<64x128xf32> to vector<128xf32>
    %21 = vector.shape_cast %20 : vector<128xf32> to vector<1x128xf32>
    %c0_15 = arith.constant 0 : index
    %c0_16 = arith.constant 0 : index
    %22 = vector.load %arg7[%c0_15, %c0_16] : memref<1x1xf32, #tpu.memory_space<vmem>>, vector<1x1xf32>
    %23 = vector.broadcast %22 : vector<1x1xf32> to vector<1x128xf32>
    %24 = arith.addf %21, %23 : vector<1x128xf32>
    %c0_17 = arith.constant 0 : index
    %c0_18 = arith.constant 0 : index
    %25 = vector.load %arg8[%c0_17, %c0_18] : memref<1x128xf32, #tpu.memory_space<vmem>>, vector<1x128xf32>
    tpu.vector_store %arg8[%c0_17, %c0_18], %24 {strides = array<i32>} : memref<1x128xf32, #tpu.memory_space<vmem>>, vector<1x128xf32>,
    return
  }
  func.func @transform_0(%arg0: i32) -> (i32, i32) {
    %c0_i32 = arith.constant 0 : i32
    %c0_i32_0 = arith.constant 0 : i32
    return %c0_i32, %arg0 : i32, i32
  }
  func.func @transform_1(%arg0: i32) -> (i32, i32) {
    %c0_i32 = arith.constant 0 : i32
    %c0_i32_0 = arith.constant 0 : i32
    %c0_i32_1 = arith.constant 0 : i32
    return %c0_i32, %c0_i32_0 : i32, i32
  }
  func.func @transform_2(%arg0: i32) -> (i32, i32) {
    %c0_i32 = arith.constant 0 : i32
    %c0_i32_0 = arith.constant 0 : i32
    %c0_i32_1 = arith.constant 0 : i32
    return %c0_i32, %c0_i32_0 : i32, i32
  }
  func.func @transform_3(%arg0: i32) -> (i32, i32) {
    %c0_i32 = arith.constant 0 : i32
    %c0_i32_0 = arith.constant 0 : i32
    %c0_i32_1 = arith.constant 0 : i32
    return %c0_i32, %c0_i32_0 : i32, i32
  }
  func.func @transform_4(%arg0: i32) -> (i32, i32) {
    %c0_i32 = arith.constant 0 : i32
    %c0_i32_0 = arith.constant 0 : i32
    %c0_i32_1 = arith.constant 0 : i32
    return %c0_i32, %c0_i32_0 : i32, i32
  }
  func.func @transform_5(%arg0: i32) -> (i32, i32) {
    %c0_i32 = arith.constant 0 : i32
    %c0_i32_0 = arith.constant 0 : i32
    %c0_i32_1 = arith.constant 0 : i32
    return %c0_i32, %c0_i32_0 : i32, i32
  }
  func.func @transform_6(%arg0: i32) -> (i32, i32) {
    %c0_i32 = arith.constant 0 : i32
    %c0_i32_0 = arith.constant 0 : i32
    %c0_i32_1 = arith.constant 0 : i32
    return %c0_i32, %c0_i32_0 : i32, i32
  }
  func.func @transform_7(%arg0: i32) -> (i32, i32) {
    %c0_i32 = arith.constant 0 : i32
    %c0_i32_0 = arith.constant 0 : i32
    return %c0_i32, %arg0 : i32, i32
  }
}

</mosaic_0001>

<bundles_post_ra>
// kernel: tpu_custom_call.1
= control target key start
LH: loop header
LB: loop body
LE: loop exit
PB: predicated region body
PF: predicated region fallthrough
CT: control target
= control target key end

     0   :  { %s922_s0 = inlined_call_operand.vmem [shape: f32[8,128], index: 0, kind: input, shape index: {}]   ;;  %s923_s1 = inlined_call_operand.vmem [shape: bf16[128,8], index: 1, kind: input, shape index: {}]   ;;  %s924_s2 = inlined_call_operand.vmem [shape: f32[128,1], index: 2, kind: input, shape index: {}]   ;;  %s925_s3 = inlined_call_operand.vmem [shape: bf16[64,128], index: 3, kind: input, shape index: {}]   ;;  %s926_s4 = inlined_call_operand.vmem [shape: f32[64,1], index: 4, kind: input, shape index: {}]   ;;  %s927_s5 = inlined_call_operand.vmem [shape: f32[64,1], index: 5, kind: input, shape index: {}]   ;;  %s928_s6 = inlined_call_operand.<no memory space> [shape: f32[1,1], index: 6, kind: input, shape index: {}]   ;;  %s929_s7 = inlined_call_operand.hbm [shape: f32[1,128], index: 7, kind: output, shape index: {}]  }
   0x1   :  { %v12_v0 = vstv %s928_s6 }
   0x2   :  { %13 = vst [vmem:[#allocation2] sm:$0x1] %v12_v0 }
   0x3   :  { %v30_v1 = vld [vmem:[%s922_s0] sm:$0xff]  ;;  %vm209_vm0 = vcmask 1043456   ;;  %vm184_vm1 = vcmask 64512   ;;  %v687_v5 = vld [vmem:[%s923_s1 + $0x8] sm:$0xff]   ;;  %v688_v6 = vld [vmem:[%s923_s1 + $0x10] sm:$0xff]   ;;  %v722_v7 = vmov 0  }
   0x4   :  { %v31_v2 = vpack.c.bf16 %v30_v1, %v30_v1  ;;  %v686_v3 = vld [vmem:[%s923_s1] sm:$0xff]   ;;  %684 = vset.pattern.permute.xlu0 %v722_v7  ;;  %685 = vset.pattern.permute.xlu1 %v722_v7  ;;  %v49_v9 = vld [vmem:[%s924_s2 + $0x8] sm:$0xff]  ;;  %v50_v10 = vld [vmem:[%s924_s2 + $0x10] sm:$0xff] }
   0x5   :  { %625 = vmatprep.mubr.msk.bf16.mxu0 %vm184_vm1, %v686_v3  ;;  %v48_v8 = vld [vmem:[%s924_s2] sm:$0xff]  ;;  %76 = vperm.xlu1 %685, %v50_v10   ;;  %v689_v11 = vld [vmem:[%s923_s1 + $0x18] sm:$0xff]   ;;  %v53_v15 = vld [vmem:[%s924_s2 + $0x28] sm:$0xff] }
   0x6   :  { %681 = vmatprep.subr.msk.bf16.mxu0 %vm209_vm0, %v31_v2  ;;  %v211_v4 = vsel %vm209_vm0, %v31_v2, 0  ;;  %66 = vperm.xlu0 %684, %v48_v8   ;;  %v51_v12 = vld [vmem:[%s924_s2 + $0x18] sm:$0xff]  ;;  %v690_v13 = vld [vmem:[%s923_s1 + $0x20] sm:$0xff]   ;;  %v54_v16 = vld [vmem:[%s924_s2 + $0x30] sm:$0xff] }
   0x7   :  { %624 = vmatpush3.bf16.msra.mxu0 %v211_v4  ;;  %v52_v14 = vld [vmem:[%s924_s2 + $0x20] sm:$0xff]  ;;  %v691_v17 = vld [vmem:[%s923_s1 + $0x28] sm:$0xff]   ;;  %v692_v18 = vld [vmem:[%s923_s1 + $0x30] sm:$0xff]  }
   0x8   :  { %v56_v19 = vld [vmem:[%s924_s2 + $0x40] sm:$0xff]  ;;  %v55_v20 = vld [vmem:[%s924_s2 + $0x38] sm:$0xff] }
   0x9   :  { %81 = vperm.xlu1 %685, %v51_v12  }
   0xa   :  { %626 = vmatmul.mubr.msk.bf16.vlgmr.msra.gmra.mrb[0].mxu0 %vm184_vm1, %v687_v5  ;;  %71 = vperm.xlu0 %684, %v49_v9  }
   0xb   :  { %629 = vmatprep.mubr.msk.bf16.mxu0 %vm184_vm1, %v688_v6 }
   0xd   :  { %91 = vperm.xlu1 %685, %v53_v15  }
   0xe   :  { %86 = vperm.xlu0 %684, %v52_v14  }
  0x11   :  { %101 = vperm.xlu1 %685, %v55_v20  }
  0x12   :  { %630 = vmatmul.mubr.msk.bf16.gmra.mrb[4].mxu0 %vm184_vm1, %v689_v11  ;;  %96 = vperm.xlu0 %684, %v54_v16  }
  0x13   :  { %633 = vmatprep.mubr.msk.bf16.mxu0 %vm184_vm1, %v690_v13 }
  0x14   :  { %14 = vsyncpa [#allocation4], 0  ;;  %v57_v21 = vld [vmem:[%s924_s2 + $0x48] sm:$0xff]  ;;  %v58_v22 = vld [vmem:[%s924_s2 + $0x50] sm:$0xff] }
  0x15   :  { %111 = vperm.xlu1 %685, %v57_v21   ;;  %v693_v23 = vld [vmem:[%s923_s1 + $0x38] sm:$0xff]   ;;  %v60_v25 = vld [vmem:[%s924_s2 + $0x60] sm:$0xff]  ;;  %v61_v26 = vld [vmem:[%s924_s2 + $0x68] sm:$0xff] }
  0x16   :  { %106 = vperm.xlu0 %684, %v56_v19   ;;  %v59_v24 = vld [vmem:[%s924_s2 + $0x58] sm:$0xff]  ;;  %v62_v27 = vld [vmem:[%s924_s2 + $0x70] sm:$0xff]  ;;  %v342_v29 = vld [vmem:[%s926_s4] sm:$0xff] }
  0x17   :  { %v63_v28 = vld [vmem:[%s924_s2 + $0x78] sm:$0xff]  ;;  %v343_v30 = vld [vmem:[%s926_s4 + $0x8] sm:$0xff]  ;;  %v344_v31 = vld [vmem:[%s926_s4 + $0x10] sm:$0xff] }
  0x18   :  { %v345_v32 = vld [vmem:[%s926_s4 + $0x18] sm:$0xff]  ;;  %v487_v33 = vld [vmem:[%s927_s5] sm:$0xff]  ;;  %v488_v34 = vld [vmem:[%s927_s5 + $0x8] sm:$0xff] }
  0x19   :  { %121 = vperm.xlu1 %685, %v59_v24   ;;  %v346_v35 = vld [vmem:[%s926_s4 + $0x20] sm:$0xff]  ;;  %v489_v36 = vld [vmem:[%s927_s5 + $0x10] sm:$0xff]  ;;  %v347_v37 = vld [vmem:[%s926_s4 + $0x28] sm:$0xff] }
  0x1a   :  { %634 = vmatmul.mubr.msk.bf16.gmra.mrb[8].mxu0 %vm184_vm1, %v691_v17  ;;  %116 = vperm.xlu0 %684, %v58_v22   ;;  %v490_v38 = vld [vmem:[%s927_s5 + $0x18] sm:$0xff]  ;;  %v348_v39 = vld [vmem:[%s926_s4 + $0x30] sm:$0xff]  ;;  %v491_v40 = vld [vmem:[%s927_s5 + $0x20] sm:$0xff] }
  0x1b   :  { %637 = vmatprep.mubr.msk.bf16.mxu0 %vm184_vm1, %v692_v18  ;;  %v349_v41 = vld [vmem:[%s926_s4 + $0x38] sm:$0xff]  ;;  %v492_v42 = vld [vmem:[%s927_s5 + $0x28] sm:$0xff]  ;;  %v493_v43 = vld [vmem:[%s927_s5 + $0x30] sm:$0xff] }
  0x1c   :  { %v494_v44 = vld [vmem:[%s927_s5 + $0x38] sm:$0xff]  ;;  %v556_v45 = vld [vmem:[#allocation2] sm:$0x1]  ;;  %v695_v47 = vld [vmem:[%s925_s3 + $0x10] sm:$0xff]  }
  0x1d   :  { %131 = vperm.xlu1 %685, %v61_v26   ;;  %v694_v46 = vld [vmem:[%s925_s3] sm:$0xff]   ;;  %661 = vmatprep.mubr.bf16.mxu1 %v695_v47 }
  0x1e   :  { %126 = vperm.xlu0 %684, %v60_v25  }
  0x21   :  { %141 = vperm.xlu1 %685, %v63_v28  }
  0x22   :  { %638 = vmatmul.mubr.msk.bf16.gmra.mrb[12].mxu0 %vm184_vm1, %v693_v23  ;;  %136 = vperm.xlu0 %684, %v62_v27  }
  0x23   :  { %657 = vmatprep.mubr.bf16.mxu0 %v694_v46 }
  0x25   :  { %357 = vperm.xlu1 %685, %v343_v30  }
  0x26   :  { %352 = vperm.xlu0 %684, %v342_v29  }
  0x29   :  { %367 = vperm.xlu1 %685, %v345_v32  }
  0x2a   :  { %362 = vperm.xlu0 %684, %v344_v31  }
  0x2d   :  { %502 = vperm.xlu1 %685, %v488_v34  }
  0x2e   :  { %497 = vperm.xlu0 %684, %v487_v33  }
  0x31   :  { %507 = vperm.xlu1 %685, %v489_v36  }
  0x32   :  { %372 = vperm.xlu0 %684, %v346_v35  }
  0x35   :  { %512 = vperm.xlu1 %685, %v490_v38  }
  0x36   :  { %377 = vperm.xlu0 %684, %v347_v37  }
  0x39   :  { %517 = vperm.xlu1 %685, %v491_v40  }
  0x3a   :  { %382 = vperm.xlu0 %684, %v348_v39  }
  0x3d   :  { %522 = vperm.xlu1 %685, %v492_v42  }
  0x3e   :  { %387 = vperm.xlu0 %684, %v349_v41  }
  0x41   :  { %532 = vperm.xlu1 %685, %v494_v44  }
  0x42   :  { %527 = vperm.xlu0 %684, %v493_v43  }
  0x46   :  { %559 = vperm.xlu0 %684, %v556_v45  }
  0x84   :  { %v77_v49 = vpop.permute.xlu1 %76 }
  0x85   :  { %v67_v48 = vpop.permute.xlu0 %66 }
  0x88   :  { %v82_v51 = vpop.permute.xlu1 %81 }
  0x89   :  { %v72_v50 = vpop.permute.xlu0 %71 }
  0x8c   :  { %v92_v53 = vpop.permute.xlu1 %91 }
  0x8d   :  { %v87_v52 = vpop.permute.xlu0 %86 }
  0x90   :  { %v102_v58 = vpop.permute.xlu1 %101 }
  0x91   :  { %v97_v54 = vpop.permute.xlu0 %96 }
  0x94   :  { %v112_v6 = vpop.permute.xlu1 %111 }
  0x95   :  { %v107_v2 = vpop.permute.xlu0 %106 }
  0x98   :  { %v122_v19 = vpop.permute.xlu1 %121 }
  0x99   :  { %v117_v15 = vpop.permute.xlu0 %116 }
  0x9c   :  { %v132_v32 = vpop.permute.xlu1 %131 }
  0x9d   :  { %v127_v27 = vpop.permute.xlu0 %126 }
  0xa0   :  { %v142_v44 = vpop.permute.xlu1 %141 }
  0xa1   :  { %v137_v39 = vpop.permute.xlu0 %136 }
  0xdd   :  { %v627_v55 = vpop.f32.mrb[0].mxu0 }
  0xde   :  { %v256_v56 = vadd.f32 %v627_v55, %v77_v49  ;;  %v247_v57 = vpop.f32.mrb[1].mxu0 }
  0xdf   :  { %v248_v59 = vadd.f32 %v247_v57, %v67_v48  ;;  %v628_v60 = vpop.f32.mrb[2].mxu0  ;;  %v697_v57 = vld [vmem:[%s925_s3 + $0x18] sm:$0xff]  }
  0xe0   :  { %v259_v61 = vadd.f32 %v628_v60, %v82_v51  ;;  %v250_v62 = vpop.f32.mrb[3].mxu0  ;;  %v312_v0 = vmax.f32 %v256_v56, 0.0  ;;  %v696_v56 = vld [vmem:[%s925_s3 + $0x8] sm:$0xff]   ;;  %s723_s3 = smov [#allocation3]  }
  0xe1   :  { %v251_v63 = vadd.f32 %v250_v62, %v72_v50  ;;  %v310_v3 = vmax.f32 %v248_v59, 0.0  ;;  %v358_v59 = vpop.permute.xlu1 %357  ;;  %s574_s10 = sshll.u32 %s723_s3, 4  ;;  %s575_s10 = int_to_ptr.vmem [resolvable:$true] %s574_s10 }
  0xe2   :  { %v313_v1 = vmax.f32 %v259_v61, 0.0  ;;  %s698_s11 = scalar_lea.vmem %s575_s10, 16  ;;  %s702_s12 = scalar_lea.vmem %s575_s10, 32 }
  0xe3   :  { %v311_v4 = vmax.f32 %v251_v63, 0.0  ;;  %p699_p0 = scmp.ne.s32.totalorder %s575_s10, %s698_s11  ;;  %p703_p1 = scmp.lt.s32.totalorder %s575_s10, %s575_s10 }
  0xe4   :  { %v327_v5 = vpack.c.bf16 %v313_v1, %v312_v0  ;;  %p704_p2 = scmp.lt.s32.totalorder %s702_s12, %s698_s11 }
  0xe5   :  { %v326_v7 = vpack.c.bf16 %v311_v4, %v310_v3  ;;  %v631_v8 = vpop.f32.mrb[4].mxu0  ;;  %v368_v61 = vpop.permute.xlu1 %367 }
  0xe6   :  { %v272_v9 = vadd.f32 %v631_v8, %v97_v54  ;;  %v263_v10 = vpop.f32.mrb[5].mxu0  ;;  %p705_p3 = por %p704_p2, %p703_p1 }
  0xe7   :  { %v264_v11 = vadd.f32 %v263_v10, %v87_v52  ;;  %v632_v12 = vpop.f32.mrb[6].mxu0  ;;  %641 = vmatprep.subr.bf16.mxu0 %v326_v7  ;;  %665 = vmatprep.subr.bf16.mxu1 %v326_v7 }
  0xe8   :  { %v275_v13 = vadd.f32 %v632_v12, %v102_v58  ;;  %v266_v14 = vpop.f32.mrb[7].mxu0  ;;  %642 = vmatpush3.bf16.msra.mxu0 %v326_v7  ;;  %673 = vmatpush3.bf16.msra.mxu1 %v326_v7  ;;  %v316_v17 = vmax.f32 %v272_v9, 0.0  ;;  %v353_v58 = vpop.permute.xlu0 %352  ;;  %p706_p4 = pnand %p705_p3, %p699_p0 }
  0xe9   :  { %v267_v16 = vadd.f32 %v266_v14, %v92_v53  ;;  %643 = vmatprep.subr.bf16.mxu0 %v327_v5  ;;  %666 = vmatprep.subr.bf16.mxu1 %v327_v5  ;;  %v314_v20 = vmax.f32 %v264_v11, 0.0  ;;  %v503_v63 = vpop.permute.xlu1 %502 }
  0xea   :  { %v317_v18 = vmax.f32 %v275_v13, 0.0 }
  0xeb   :  { %v315_v21 = vmax.f32 %v267_v16, 0.0 }
  0xec   :  { %v329_v22 = vpack.c.bf16 %v317_v18, %v316_v17  ;;  %644 = vmatpush3.bf16.msra.mxu0 %v327_v5  ;;  %674 = vmatpush3.bf16.msra.mxu1 %v327_v5  ;;  %v363_v60 = vpop.permute.xlu0 %362 }
  0xed   :  { %v328_v23 = vpack.c.bf16 %v315_v21, %v314_v20  ;;  %v635_v24 = vpop.f32.mrb[8].mxu0  ;;  %v508_v1 = vpop.permute.xlu1 %507 }
  0xee   :  { %v288_v25 = vadd.f32 %v635_v24, %v117_v15  ;;  %v279_v26 = vpop.f32.mrb[9].mxu0 }
  0xef   :  { %v280_v28 = vadd.f32 %v279_v26, %v107_v2  ;;  %v636_v29 = vpop.f32.mrb[10].mxu0  ;;  %645 = vmatprep.subr.bf16.mxu0 %v328_v23  ;;  %667 = vmatprep.subr.bf16.mxu1 %v328_v23 }
  0xf0   :  { %v291_v30 = vadd.f32 %v636_v29, %v122_v19  ;;  %v282_v31 = vpop.f32.mrb[11].mxu0  ;;  %646 = vmatpush3.bf16.msra.mxu0 %v328_v23  ;;  %675 = vmatpush3.bf16.msra.mxu1 %v328_v23  ;;  %v320_v34 = vmax.f32 %v288_v25, 0.0  ;;  %v498_v62 = vpop.permute.xlu0 %497 }
  0xf1   :  { %v283_v33 = vadd.f32 %v282_v31, %v112_v6  ;;  %647 = vmatprep.subr.bf16.mxu0 %v329_v22  ;;  %668 = vmatprep.subr.bf16.mxu1 %v329_v22  ;;  %v318_v36 = vmax.f32 %v280_v28, 0.0  ;;  %v513_v3 = vpop.permute.xlu1 %512 }
  0xf2   :  { %v321_v35 = vmax.f32 %v291_v30, 0.0 }
  0xf3   :  { %v319_v37 = vmax.f32 %v283_v33, 0.0 }
  0xf4   :  { %v331_v38 = vpack.c.bf16 %v321_v35, %v320_v34  ;;  %648 = vmatpush3.bf16.msra.mxu0 %v329_v22  ;;  %676 = vmatpush3.bf16.msra.mxu1 %v329_v22  ;;  %v373_v0 = vpop.permute.xlu0 %372 }
  0xf5   :  { %v330_v40 = vpack.c.bf16 %v319_v37, %v318_v36  ;;  %v639_v41 = vpop.f32.mrb[12].mxu0  ;;  %v518_v21 = vpop.permute.xlu1 %517 }
  0xf6   :  { %v304_v42 = vadd.f32 %v639_v41, %v137_v39  ;;  %v295_v43 = vpop.f32.mrb[13].mxu0 }
  0xf7   :  { %v296_v45 = vadd.f32 %v295_v43, %v127_v27  ;;  %v640_v46 = vpop.f32.mrb[14].mxu0  ;;  %649 = vmatprep.subr.bf16.mxu0 %v330_v40  ;;  %669 = vmatprep.subr.bf16.mxu1 %v330_v40 }
  0xf8   :  { %v307_v47 = vadd.f32 %v640_v46, %v142_v44  ;;  %v298_v48 = vpop.f32.mrb[15].mxu0  ;;  %650 = vmatpush3.bf16.msra.mxu0 %v330_v40  ;;  %677 = vmatpush3.bf16.msra.mxu1 %v330_v40  ;;  %v324_v50 = vmax.f32 %v304_v42, 0.0  ;;  %v378_v2 = vpop.permute.xlu0 %377 }
  0xf9   :  { %v299_v49 = vadd.f32 %v298_v48, %v132_v32  ;;  %651 = vmatprep.subr.bf16.mxu0 %v331_v38  ;;  %670 = vmatprep.subr.bf16.mxu1 %v331_v38  ;;  %v322_v52 = vmax.f32 %v296_v45, 0.0  ;;  %v523_v35 = vpop.permute.xlu1 %522  ;;  %v562_v48 = vlaneseq }
  0xfa   :  { %v325_v51 = vmax.f32 %v307_v47, 0.0 }
  0xfb   :  { %v323_v53 = vmax.f32 %v299_v49, 0.0 }
  0xfc   :  { %v333_v54 = vpack.c.bf16 %v325_v51, %v324_v50  ;;  %652 = vmatpush3.bf16.msra.mxu0 %v331_v38  ;;  %678 = vmatpush3.bf16.msra.mxu1 %v331_v38  ;;  %v383_v17 = vpop.permute.xlu0 %382  ;;  %v563_v51 = vshrl.u32 %v562_v48, 7 }
  0xfd   :  { %v332_v55 = vpack.c.bf16 %v323_v53, %v322_v52  ;;  %v533_v45 = vpop.permute.xlu1 %532 }
  0xff   :  { %653 = vmatprep.subr.bf16.mxu0 %v332_v55  ;;  %671 = vmatprep.subr.bf16.mxu1 %v332_v55 }
 0x100   :  { %654 = vmatpush3.bf16.msra.mxu0 %v332_v55  ;;  %679 = vmatpush3.bf16.msra.mxu1 %v332_v55  ;;  %v388_v30 = vpop.permute.xlu0 %387 }
 0x101   :  { %655 = vmatprep.subr.bf16.mxu0 %v333_v54  ;;  %672 = vmatprep.subr.bf16.mxu1 %v333_v54 }
 0x104   :  { %656 = vmatpush3.bf16.msra.mxu0 %v333_v54  ;;  %680 = vmatpush3.bf16.msra.mxu1 %v333_v54  ;;  %v528_v42 = vpop.permute.xlu0 %527  ;;  %v564_v54 = vsub.s32 0, %v563_v51 }
 0x107   :  { %658 = vmatmul.mubr.bf16.vlgmr.msra.gmra.mrb[16].mxu0 %v696_v56  ;;  %662 = vmatmul.mubr.bf16.vlgmr.msra.gmra.mrb[0].mxu1 %v697_v57 }
 0x108   :  { %v560_v56 = vpop.permute.xlu0 %559 }
 0x1da   :  { %v659_v4 = vpop.f32.mrb[16].mxu0  ;;  %v663_v5 = vpop.f32.mrb[0].mxu1 }
 0x1db   :  { %v448_v6 = vpop.f32.mrb[17].mxu0  ;;  %v464_v7 = vpop.f32.mrb[1].mxu1  ;;  %v457_v8 = vadd.f32 %v659_v4, %v363_v60  ;;  %v473_v27 = vadd.f32 %v663_v5, %v383_v17 }
 0x1dc   :  { %v449_v9 = vadd.f32 %v448_v6, %v353_v58  ;;  %v660_v10 = vpop.f32.mrb[18].mxu0  ;;  %v664_v11 = vpop.f32.mrb[2].mxu1  ;;  %v465_v19 = vadd.f32 %v464_v7, %v373_v0  ;;  %v565_v58 = vrot.slane %v560_v56, %v564_v54 }
 0x1dd   :  { %v451_v12 = vpop.f32.mrb[19].mxu0  ;;  %v467_v13 = vpop.f32.mrb[3].mxu1  ;;  %v460_v15 = vadd.f32 %v660_v10, %v368_v61  ;;  %v481_v18 = vmax.f32 %v457_v8, 0.0  ;;  %v476_v32 = vadd.f32 %v664_v11, %v388_v30  ;;  %v485_v36 = vmax.f32 %v473_v27, 0.0 }
 0x1de   :  { %v479_v14 = vmax.f32 %v449_v9, 0.0  ;;  %v452_v16 = vadd.f32 %v451_v12, %v358_v59  ;;  %v468_v25 = vadd.f32 %v467_v13, %v378_v2  ;;  %v483_v28 = vmax.f32 %v465_v19, 0.0 }
 0x1df   :  { %v482_v23 = vmax.f32 %v460_v15, 0.0  ;;  %v537_v26 = vmul.f32 %v508_v1, %v481_v18  ;;  %v486_v39 = vmax.f32 %v476_v32, 0.0  ;;  %v541_v43 = vmul.f32 %v528_v42, %v485_v36 }
 0x1e0   :  { %v480_v20 = vmax.f32 %v452_v16, 0.0  ;;  %v535_v22 = vmul.f32 %v498_v62, %v479_v14  ;;  %v484_v34 = vmax.f32 %v468_v25, 0.0  ;;  %v539_v37 = vmul.f32 %v518_v21, %v483_v28 }
 0x1e1   :  { %v538_v31 = vmul.f32 %v513_v3, %v482_v23  ;;  %v542_v46 = vmul.f32 %v533_v45, %v486_v39 }
 0x1e2   :  { %v536_v24 = vmul.f32 %v503_v63, %v480_v20  ;;  %v540_v40 = vmul.f32 %v523_v35, %v484_v34 }
 0x1e4   :  { %v543_v29 = vadd.f32 %v536_v24, %v535_v22 }
 0x1e6   :  { %v544_v33 = vadd.f32 %v543_v29, %v537_v26 }
 0x1e8   :  { %v545_v38 = vadd.f32 %v544_v33, %v538_v31 }
 0x1ea   :  { %v546_v41 = vadd.f32 %v545_v38, %v539_v37 }
 0x1ec   :  { %v547_v44 = vadd.f32 %v546_v41, %v540_v40 }
 0x1ee   :  { %v548_v47 = vadd.f32 %v547_v44, %v541_v43 }
 0x1f0   :  { %v549_v49 = vadd.f32 %v548_v47, %v542_v46 }
 0x1f2   :  { %v550_v50 = vrot.slane %v549_v49, 4 }
 0x1f4   :  { %v551_v52 = vadd.f32 %v550_v50, %v549_v49 }
 0x1f6   :  { %v552_v53 = vrot.slane %v551_v52, 2 }
 0x1f8   :  { %v553_v55 = vadd.f32 %v552_v53, %v551_v52 }
 0x1fa   :  { %v554_v57 = vrot.slane %v553_v55, 1 }
 0x1fc   :  { %v555_v59 = vadd.f32 %v554_v57, %v553_v55 }
 0x1fe   :  { %v566_v60 = vadd.f32 %v565_v58, %v555_v59 }
 0x200   :  { %567 = vst [vmem:[#allocation3] sm:$0x1] %v566_v60 }
 0x201   :  { %709 = shalt.err (!%p706_p4)
}
 0x202   :  { %s710_s15 = scalar_lea.hbm %s929_s7, 16 }
 0x203   :  { %p711_p5 = scmp.ne.s32.totalorder %s929_s7, %s710_s15  ;;  %p714_p6 = scmp.lt.u32.totalorder %s710_s15, %s929_s7 }
 0x205   :  { %p716_p7 = pnand %p714_p6, %p711_p5 }
 0x207   :  { %719 = shalt.err (!%p716_p7)
}
 0x208   :  { %577 = dma.vmem_to_hbm [thread:$0]  %s575_s10, 16, %s929_s7, [#allocation4]  }
 0x209   :  { %720 = dma.done.wait [#allocation4], 16  }
 0x20a   :  { %721 = vsyncadd [#allocation4], 4294967280 }
 0x20b   :  { %581 = vsyncpa [#allocation4], 1 }

</bundles_post_ra>
